<compile_context>
chip_gen: v7x
topology: tpu7x:2x2x1
jax: 0.10.0
libtpu: 0.0.40
codegen_flags: <defaults>
</compile_context>

<pallas_src>
import functools
import math

import numpy as np
import jax
import jax.numpy as jnp
from jax import lax
from jax.experimental import pallas as pl
from jax.experimental.pallas import tpu as pltpu


def _round_up(x, m):
    return ((x + m - 1) // m) * m


# ----------------------------------------------------------------------------
# Kernel 1: ToPoincare (clip -> expmap0 -> project)
# ----------------------------------------------------------------------------
def _to_poincare_kernel(x_ref, o_ref, *, c, clip_r):
    x = x_ref[...].astype(jnp.float32)
    sqrt_c = c ** 0.5
    # Single cross-lane reduction per row; remaining norms are analytic.
    xn = jnp.sqrt(jnp.sum(x * x, axis=-1, keepdims=True)) + 1e-5
    fac = jnp.minimum(jnp.float32(1.0), clip_r / xn)
    xc = x * fac                                  # clipped features
    cl_norm = (xn - 1e-5) * fac                   # == ||xc||  (analytic)
    un = jnp.maximum(cl_norm, 1e-5)
    th = jnp.tanh(jnp.minimum(sqrt_c * un, 15.0))
    inv = 1.0 / (sqrt_c * un)
    g = th * xc * inv                             # expmap0
    gn = jnp.maximum(th * cl_norm * inv, 1e-5)    # == max(||g||, 1e-5)
    maxnorm = (1.0 - 1e-3) / sqrt_c
    o_ref[...] = jnp.where(gn > maxnorm, g / gn * maxnorm, g)


def to_poincare(x, c, clip_r, row_tile=256):
    n, d = x.shape
    ti = min(row_tile, _round_up(n, 8))
    n_pad = _round_up(n, ti)
    xp = jnp.pad(x, ((0, n_pad - n), (0, 0))) if n_pad != n else x
    out = pl.pallas_call(
        functools.partial(_to_poincare_kernel, c=float(c), clip_r=float(clip_r)),
        out_shape=jax.ShapeDtypeStruct((n_pad, d), jnp.float32),
        grid_spec=pltpu.PrefetchScalarGridSpec(
            num_scalar_prefetch=0,
            grid=(n_pad // ti,),
            in_specs=[pl.BlockSpec((ti, d), lambda i: (i, 0))],
            out_specs=pl.BlockSpec((ti, d), lambda i: (i, 0)),
        ),
        compiler_params=pltpu.CompilerParams(dimension_semantics=("parallel",)),
    )(xp)
    return out[:n] if n_pad != n else out


# ----------------------------------------------------------------------------
# Kernel 2: hyperbolic pairwise distance matrix
#   dist(x, y) = 2/sqrt(c) * artanh(sqrt(c) * || (-x) (+)_c y ||)
# Mobius-addition norm computed analytically from x.y^T, |x|^2, |y|^2.
# ----------------------------------------------------------------------------
def _hyp_dist_kernel(x_ref, y_ref, y2_ref, o_ref, *, c):
    sqrt_c = c ** 0.5
    xb = x_ref[...].astype(jnp.float32)            # (TI, D)
    u = -xb                                        # mobius_addition_batch(-x, y)
    # MXU contraction on last dims (no y^T materialization); bf16 operands,
    # f32 accumulation.  All subsequent math stays in f32.
    xy = lax.dot_general(
        u.astype(jnp.bfloat16), y_ref[...].astype(jnp.bfloat16),
        dimension_numbers=(((1,), (1,)), ((), ())),
        preferred_element_type=jnp.float32)        # (TI, M)
    x2 = jnp.sum(u * u, axis=-1, keepdims=True)    # (TI, 1)
    y2 = y2_ref[...]                               # (1, M), precomputed once
    a = 1.0 + 2.0 * c * xy + c * y2
    b = 1.0 - c * x2
    # || a*u + b*y ||^2 expanded analytically
    num_sq = jnp.maximum(a * a * x2 + 2.0 * a * b * xy + b * b * y2, 0.0)
    denom = 1.0 + 2.0 * c * xy + (c * c) * x2 * y2
    norm = jnp.sqrt(num_sq) / (denom + 1e-5)
    arg = jnp.minimum(sqrt_c * norm, 1.0 - 1e-5)   # norm >= 0 -> no lower clip
    # atanh(arg) = 0.5 * log((1+arg)/(1-arg)); one log + one approx recip (EUP)
    atanh = 0.5 * jnp.log((1.0 + arg) * pl.reciprocal(1.0 - arg, approx=True))
    o_ref[...] = (2.0 / sqrt_c) * atanh


def hyp_dist_matrix(x, y, c, row_tile=256):
    n, d = x.shape
    m = y.shape[0]
    ti = min(row_tile, _round_up(n, 8))
    n_pad = _round_up(n, ti)
    xp = jnp.pad(x, ((0, n_pad - n), (0, 0))) if n_pad != n else x
    yf = y.astype(jnp.float32)
    y2 = jnp.sum(yf * yf, axis=-1, keepdims=True).T     # (1, M), computed once
    # TODO(synk): for very large M on v7x (64 MiB VMEM/TC) add a second
    # (parallel) grid axis over 128-wide column tiles and set vmem_limit_bytes.
    out = pl.pallas_call(
        functools.partial(_hyp_dist_kernel, c=float(c)),
        out_shape=jax.ShapeDtypeStruct((n_pad, m), jnp.float32),
        grid_spec=pltpu.PrefetchScalarGridSpec(
            num_scalar_prefetch=0,
            grid=(n_pad // ti,),
            in_specs=[pl.BlockSpec((ti, d), lambda i: (i, 0)),
                      pl.BlockSpec((m, d), lambda i: (0, 0)),
                      pl.BlockSpec((1, m), lambda i: (0, 0))],
            out_specs=pl.BlockSpec((ti, m), lambda i: (i, 0)),
        ),
        compiler_params=pltpu.CompilerParams(dimension_semantics=("parallel",)),
    )(xp, y, y2)
    return out[:n] if n_pad != n else out


# ----------------------------------------------------------------------------
# Kernel 3: gHHC core, tiled over triplets with an in-kernel loss accumulator.
# Hard gumbel-softmax forward == one-hot of argmax(-max_dist/tau + gumbel).
# ----------------------------------------------------------------------------
def _ghhc_kernel(di_ref, dj_ref, dk_ref, g1_ref, g2_ref, valid_ref, o_ref,
                 *, tau, mrg):
    @pl.when(pl.program_id(0) == 0)
    def _():
        o_ref[...] = jnp.zeros_like(o_ref)

    di = di_ref[...]
    dj = dj_ref[...]
    dk = dk_ref[...]
    p = di.shape[-1]
    colf = lax.broadcasted_iota(jnp.int32, di.shape, 1).astype(jnp.float32)

    def hard_onehot(logits):
        mx = jnp.max(logits, axis=-1, keepdims=True)
        cand = jnp.where(logits >= mx, colf, jnp.float32(p))
        idx = jnp.min(cand, axis=-1, keepdims=True)      # first argmax index
        return (colf == idx).astype(jnp.float32), idx

    m_ij = jnp.maximum(di, dj)
    oh1, idx1 = hard_onehot(-m_ij / tau + g1_ref[...])
    m_ijk = jnp.maximum(dk, m_ij)
    oh2, idx2 = hard_onehot(-m_ijk / tau + g2_ref[...])

    # Selection-difference trick: 3 cross-lane sums instead of 6.
    doh = oh1 - oh2
    ddi = jnp.sum(di * doh, axis=-1, keepdims=True)      # d_i_lca_ij - d_i_lca_ijk
    ddj = jnp.sum(dj * doh, axis=-1, keepdims=True)
    ddk = jnp.sum(dk * doh, axis=-1, keepdims=True)

    relu = lambda v: jnp.maximum(v, 0.0)
    hc = relu(ddi + mrg) + relu(ddj + mrg) + relu(-ddk + mrg)
    mask = (idx1 != idx2).astype(jnp.float32)
    row = hc * mask * valid_ref[...]                     # (TB, 1)
    o_ref[...] += jnp.sum(row, axis=0, keepdims=True)    # (1, 1) accumulator


def compute_gHHC_loss(cp_dist, indices_tuple, key, tau, mrg, trip_tile=512):
    i_idx, j_idx, k_idx = indices_tuple
    t = int(i_idx.shape[0])
    p = cp_dist.shape[1]
    d_i = cp_dist[jnp.asarray(i_idx, dtype=jnp.int32)]
    d_j = cp_dist[jnp.asarray(j_idx, dtype=jnp.int32)]
    d_k = cp_dist[jnp.asarray(k_idx, dtype=jnp.int32)]
    k1, k2 = jax.random.split(key)
    g1 = jax.random.gumbel(k1, (t, p), dtype=jnp.float32)
    g2 = jax.random.gumbel(k2, (t, p), dtype=jnp.float32)

    tb = min(trip_tile, _round_up(t, 8))
    tp = _round_up(t, tb)
    pad = tp - t
    padf = (lambda a: jnp.pad(a, ((0, pad), (0, 0)))) if pad else (lambda a: a)
    valid = padf(jnp.ones((t, 1), jnp.float32))

    # TODO(synk): when nb_proxies << 128, lane utilization is low; packing
    # several triplets per vreg row would need segmented reductions.
    out = pl.pallas_call(
        functools.partial(_ghhc_kernel, tau=float(tau), mrg=float(mrg)),
        out_shape=jax.ShapeDtypeStruct((1, 1), jnp.float32),
        grid_spec=pltpu.PrefetchScalarGridSpec(
            num_scalar_prefetch=0,
            grid=(tp // tb,),
            in_specs=[pl.BlockSpec((tb, p), lambda i: (i, 0))] * 5
                     + [pl.BlockSpec((tb, 1), lambda i: (i, 0))],
            out_specs=pl.BlockSpec((1, 1), lambda i: (0, 0)),
        ),
        compiler_params=pltpu.CompilerParams(dimension_semantics=("arbitrary",)),
    )(padf(d_i), padf(d_j), padf(d_k), padf(g1), padf(g2), valid)
    return out[0, 0] / t


# ----------------------------------------------------------------------------
# Host-side reciprocal triplet sampling (data-dependent shapes, numpy RNG —
# same as the PyTorch reference which uses np.random.choice on host).
# ----------------------------------------------------------------------------
def get_reciprocal_triplets(sim_matrix, topk=20, t_per_anchor=100, seed=0):
    rng = np.random.RandomState(seed)
    sim = np.asarray(sim_matrix, dtype=np.float64)
    n = sim.shape[0]
    topk_index = np.argsort(-sim, axis=1)[:, :topk]
    nn_matrix = np.zeros_like(sim)
    np.put_along_axis(nn_matrix, topk_index, 1.0, axis=1)
    s = (nn_matrix + nn_matrix.T) / 2.0
    np.fill_diagonal(s, -1.0)
    anchor, pos, neg = [], [], []
    for i in range(n):
        pos_cand = np.nonzero(s[i] == 1)[0]
        if len(pos_cand) <= 1:
            continue
        neg_cand = np.nonzero(s[i] < 1)[0]
        pos.append(rng.choice(pos_cand, t_per_anchor, replace=True))
        neg.append(rng.choice(neg_cand, t_per_anchor, replace=True))
        anchor.append(np.full(t_per_anchor, i, dtype=np.int64))
    return (np.concatenate(anchor), np.concatenate(pos), np.concatenate(neg))


# ----------------------------------------------------------------------------
# HPLoss module
# ----------------------------------------------------------------------------
class HPLoss:
    def __init__(self, nb_proxies, sz_embed, mrg=0.1, tau=0.1, hyp_c=0.1,
                 clip_r=2.3, seed=42):
        self.nb_proxies = nb_proxies
        self.sz_embed = sz_embed
        self.tau = tau
        self.hyp_c = hyp_c
        self.mrg = mrg
        self.clip_r = clip_r
        # deterministic "randn" proxy init, scaled as in the reference
        lcas = jax.random.normal(jax.random.PRNGKey(seed),
                                 (nb_proxies, sz_embed), dtype=jnp.float32)
        self.lcas = lcas / math.sqrt(sz_embed) * clip_r * 0.9

    def forward(self, z_s, t_s, y, topk=15, rng_key=None, triplet_seed=0):
        if rng_key is None:
            rng_key = jax.random.PRNGKey(1)
        bs = z_s.shape[0]

        sim_y = y @ y.T
        hot = (sim_y > 0).astype(jnp.float32)

        lcas_h = to_poincare(self.lcas, self.hyp_c, self.clip_r)

        all_nodes = jnp.concatenate([z_s, lcas_h], axis=0)
        all_dist = hyp_dist_matrix(all_nodes, all_nodes, self.hyp_c)
        t_all_nodes = jnp.concatenate([t_s, lcas_h], axis=0)
        t_all_dist = hyp_dist_matrix(t_all_nodes, t_all_nodes, self.hyp_c)

        sim_matrix = jnp.exp(-all_dist[:bs, :bs]) + hot
        sim_matrix2 = jnp.exp(-all_dist[bs:, bs:])
        t_sim_matrix = jnp.exp(-t_all_dist[:bs, :bs]) + hot
        t_sim_matrix2 = jnp.exp(-t_all_dist[bs:, bs:])

        # One batched host sync for all four similarity matrices.
        # TODO(synk): the reciprocal-triplet sampling itself is host-side
        # numpy RNG with data-dependent shapes (as in the reference); no
        # clean Pallas mapping.
        sims_host = jax.device_get(
            (sim_matrix, sim_matrix2, t_sim_matrix, t_sim_matrix2))
        triplets = [
            get_reciprocal_triplets(s, topk=topk, t_per_anchor=50,
                                    seed=triplet_seed + i)
            for i, s in enumerate(sims_host)
        ]

        keys = jax.random.split(rng_key, 4)
        cp_dists = (all_dist[:bs, bs:], all_dist[bs:, bs:],
                    t_all_dist[:bs, bs:], t_all_dist[bs:, bs:])

        total = jnp.float32(0.0)
        for cp, it, k in zip(cp_dists, triplets, keys):
            total = total + compute_gHHC_loss(cp, it, k, self.tau, self.mrg)
        return total


if __name__ == "__main__":
    bs, nb_proxies, sz_embed, num_classes = 16, 16, 32, 4

    key = jax.random.PRNGKey(0)
    kz, kt = jax.random.split(key, 2)
    # Raw Euclidean features, mapped onto the Poincare ball as the upstream
    # model would (z_s / t_s are expected to already live on the ball).
    z_raw = jax.random.normal(kz, (bs, sz_embed), dtype=jnp.float32)
    t_raw = jax.random.normal(kt, (bs, sz_embed), dtype=jnp.float32)
    z_s = to_poincare(z_raw, 0.1, 2.3)
    t_s = to_poincare(t_raw, 0.1, 2.3)

    labels = jnp.arange(bs) % num_classes
    y = jax.nn.one_hot(labels, num_classes, dtype=jnp.float32)

    loss_mod = HPLoss(nb_proxies, sz_embed, mrg=0.1, tau=0.1,
                      hyp_c=0.1, clip_r=2.3)
    total_loss = loss_mod.forward(z_s, t_s, y, topk=8,
                                  rng_key=jax.random.PRNGKey(1))
    total_loss = jax.block_until_ready(total_loss)
    assert jnp.isfinite(total_loss)
    print("KERNEL_OK")
</pallas_src>

<mosaic_0001>
module attributes {stable_mosaic.version = 11 : i64} {
  func.func @_to_poincare_kernel(%arg0: i32, %arg1: memref<16x32xf32, #tpu.memory_space<vmem>>, %arg2: memref<16x32xf32, #tpu.memory_space<vmem>>) attributes {dimension_semantics = [#tpu.dimension_semantics<parallel>], iteration_bounds = array<i64: 1>, scalar_prefetch = 0 : i64, scratch_operands = 0 : i64, tpu.core_type = #tpu.core_type<tc>, window_params = [{transform_indices = @transform_0, window_bounds = array<i64: 16, 32>}, {transform_indices = @transform_1, window_bounds = array<i64: 16, 32>}]} {
    %c0 = arith.constant 0 : index
    %c0_0 = arith.constant 0 : index
    %0 = vector.load %arg1[%c0, %c0_0] : memref<16x32xf32, #tpu.memory_space<vmem>>, vector<16x32xf32>
    %1 = arith.mulf %0, %0 : vector<16x32xf32>
    %cst = arith.constant dense<0.000000e+00> : vector<16xf32>
    %2 = vector.multi_reduction <add>, %1, %cst [1] : vector<16x32xf32> to vector<16xf32>
    %3 = vector.shape_cast %2 : vector<16xf32> to vector<16x1xf32>
    %4 = math.sqrt %3 : vector<16x1xf32>
    %cst_1 = arith.constant 9.99999974E-6 : f32
    %5 = vector.broadcast %cst_1 : f32 to vector<16x1xf32>
    %6 = arith.addf %4, %5 : vector<16x1xf32>
    %cst_2 = arith.constant 2.300000e+00 : f32
    %7 = vector.broadcast %cst_2 : f32 to vector<16x1xf32>
    %8 = arith.divf %7, %6 : vector<16x1xf32>
    %cst_3 = arith.constant 1.000000e+00 : f32
    %9 = vector.broadcast %cst_3 : f32 to vector<16x1xf32>
    %10 = arith.minimumf %9, %8 : vector<16x1xf32>
    %11 = vector.broadcast %10 : vector<16x1xf32> to vector<16x32xf32>
    %12 = arith.mulf %0, %11 : vector<16x32xf32>
    %cst_4 = arith.constant 9.99999974E-6 : f32
    %13 = vector.broadcast %cst_4 : f32 to vector<16x1xf32>
    %14 = arith.subf %6, %13 : vector<16x1xf32>
    %15 = arith.mulf %14, %10 : vector<16x1xf32>
    %cst_5 = arith.constant 9.99999974E-6 : f32
    %16 = vector.broadcast %cst_5 : f32 to vector<16x1xf32>
    %17 = arith.maximumf %15, %16 : vector<16x1xf32>
    %cst_6 = arith.constant 0.316227764 : f32
    %18 = vector.broadcast %cst_6 : f32 to vector<16x1xf32>
    %19 = arith.mulf %18, %17 : vector<16x1xf32>
    %cst_7 = arith.constant 1.500000e+01 : f32
    %20 = vector.broadcast %cst_7 : f32 to vector<16x1xf32>
    %21 = arith.minimumf %19, %20 : vector<16x1xf32>
    %22 = math.tanh %21 : vector<16x1xf32>
    %cst_8 = arith.constant 0.316227764 : f32
    %23 = vector.broadcast %cst_8 : f32 to vector<16x1xf32>
    %24 = arith.mulf %23, %17 : vector<16x1xf32>
    %cst_9 = arith.constant 1.000000e+00 : f32
    %25 = vector.broadcast %cst_9 : f32 to vector<16x1xf32>
    %26 = arith.divf %25, %24 : vector<16x1xf32>
    %27 = vector.broadcast %22 : vector<16x1xf32> to vector<16x32xf32>
    %28 = arith.mulf %27, %12 : vector<16x32xf32>
    %29 = vector.broadcast %26 : vector<16x1xf32> to vector<16x32xf32>
    %30 = arith.mulf %28, %29 : vector<16x32xf32>
    %31 = arith.mulf %22, %15 : vector<16x1xf32>
    %32 = arith.mulf %31, %26 : vector<16x1xf32>
    %cst_10 = arith.constant 9.99999974E-6 : f32
    %33 = vector.broadcast %cst_10 : f32 to vector<16x1xf32>
    %34 = arith.maximumf %32, %33 : vector<16x1xf32>
    %cst_11 = arith.constant 3.15911531 : f32
    %35 = vector.broadcast %cst_11 : f32 to vector<16x1xf32>
    %36 = arith.cmpf ogt, %34, %35 : vector<16x1xf32>
    %37 = vector.broadcast %34 : vector<16x1xf32> to vector<16x32xf32>
    %38 = arith.divf %30, %37 : vector<16x32xf32>
    %cst_12 = arith.constant 3.15911531 : f32
    %39 = vector.broadcast %cst_12 : f32 to vector<16x32xf32>
    %40 = arith.mulf %38, %39 : vector<16x32xf32>
    %41 = vector.shape_cast %36 : vector<16x1xi1> to vector<16x1xi1>
    %42 = vector.broadcast %41 : vector<16x1xi1> to vector<16x32xi1>
    %43 = arith.select %42, %40, %30 : vector<16x32xi1>, vector<16x32xf32>
    %c0_13 = arith.constant 0 : index
    %c0_14 = arith.constant 0 : index
    %44 = vector.load %arg2[%c0_13, %c0_14] : memref<16x32xf32, #tpu.memory_space<vmem>>, vector<16x32xf32>
    tpu.vector_store %arg2[%c0_13, %c0_14], %43 {strides = array<i32>} : memref<16x32xf32, #tpu.memory_space<vmem>>, vector<16x32xf32>,
    return
  }
  func.func @transform_0(%arg0: i32) -> (i32, i32) {
    %c0_i32 = arith.constant 0 : i32
    %c0_i32_0 = arith.constant 0 : i32
    return %arg0, %c0_i32 : i32, i32
  }
  func.func @transform_1(%arg0: i32) -> (i32, i32) {
    %c0_i32 = arith.constant 0 : i32
    %c0_i32_0 = arith.constant 0 : i32
    return %arg0, %c0_i32 : i32, i32
  }
}

</mosaic_0001>

<bundles_post_ra>
// kernel: tpu_custom_call.1
= control target key start
LH: loop header
LB: loop body
LE: loop exit
PB: predicated region body
PF: predicated region fallthrough
CT: control target
= control target key end

     0   :  { %6 = vsyncpa [#allocation3], 0  ;;  %s244_s0 = inlined_call_operand.hbm [shape: f32[16,32], index: 0, kind: input, shape index: {}]   ;;  %s245_s1 = inlined_call_operand.hbm [shape: f32[16,32], index: 1, kind: output, shape index: {}]  }
   0x1   :  { %7 = vsyncpa [#allocation4], 0  ;;  %s191_s6 = smov [#allocation2]   ;;  %s143_s10 = scalar_lea.hbm %s244_s0, 256 }
   0x2   :  { %s13_s7 = sshll.u32 %s191_s6, 4  ;;  %p144_p0 = scmp.ne.s32.totalorder %s244_s0, %s143_s10  ;;  %s14_s7 = int_to_ptr.vmem [resolvable:$true] %s13_s7 }
   0x3   :  { %p147_p1 = scmp.lt.u32.totalorder %s143_s10, %s244_s0 }
   0x5   :  { %p149_p2 = pnand %p147_p1, %p144_p0 }
   0x7   :  { %152 = shalt.err (!%p149_p2)
}
   0x8   :  { %s153_s15 = scalar_lea.vmem %s14_s7, 256  ;;  %p158_p4 = scmp.lt.s32.totalorder %s14_s7, %s14_s7 }
   0x9   :  { %p154_p3 = scmp.ne.s32.totalorder %s14_s7, %s153_s15  ;;  %p159_p5 = scmp.lt.s32.totalorder %s153_s15, %s153_s15 }
   0xb   :  { %p160_p6 = por %p159_p5, %p158_p4 }
   0xd   :  { %p161_p7 = pnand %p160_p6, %p154_p3 }
   0xf   :  { %164 = shalt.err (!%p161_p7)
}
  0x10   :  { %s192_s16 = smov 128   ;;  %s193_s17 = smov 8  }
  0x11   :  { %19 = dma.hbm_to_vmem [thread:$0]  %s244_s0, 256, %s14_s7, [#allocation3], %s192_s16, %s192_s16, %s193_s17  }
  0x12   :  { %187 = dma.done.wait [#allocation3], 256  }
  0x13   :  { %188 = vsyncadd [#allocation3], 4294967040  ;;  %v23_v0 = vld [vmem:[#allocation2] sm:$0xff]  ;;  %vm27_vm0 = vcmask 261120   ;;  %v220_v1 = vld [vmem:[#allocation2 + $0x8] sm:$0xff]  ;;  %s194_s0 = smov [#allocation5]  }
  0x14   :  { %v25_v2 = vmul.f32 %v23_v0, %v23_v0  ;;  %v26_v3 = vmul.f32 %v220_v1, %v220_v1  ;;  %s105_s20 = sshll.u32 %s194_s0, 4  ;;  %s106_s20 = int_to_ptr.vmem [resolvable:$true] %s105_s20 }
  0x15   :  { %s165_s21 = scalar_lea.vmem %s106_s20, 256  ;;  %p170_p9 = scmp.lt.s32.totalorder %s106_s20, %s106_s20 }
  0x16   :  { %v28_v4 = vsel %vm27_vm0, %v25_v2, 0.0  ;;  %v31_v5 = vsel %vm27_vm0, %v26_v3, 0.0  ;;  %p166_p8 = scmp.ne.s32.totalorder %s106_s20, %s165_s21  ;;  %p171_p10 = scmp.lt.s32.totalorder %s165_s21, %s165_s21 }
  0x17   :  { %29 = vadd.xlane.f32.xlu0 %v28_v4 }
  0x18   :  { %p172_p11 = por %p171_p10, %p170_p9 }
  0x1a   :  { %p173_p12 = pnand %p172_p11, %p166_p8 }
  0x1b   :  { %32 = vadd.xlane.f32.xlu0 %v31_v5 }
  0xa4   :  { %v30_v6 = vpop.xlane.xlu0 %29 }
  0xa5   :  { %123 = vrsqrt.f32 %v30_v6  ;;  %vm36_vm1 = vcmp.eq.f32.partialorder %v30_v6, inf  ;;  %v39_v10 = vand.u32 2147483648, %v30_v6  ;;  %vm38_vm2 = vcmp.eq.f32.partialorder %v30_v6, 0.0 }
  0xa8   :  { %v33_v7 = vpop.xlane.xlu0 %32 }
  0xa9   :  { %125 = vrsqrt.f32 %v33_v7  ;;  %vm43_vm3 = vcmp.eq.f32.partialorder %v33_v7, inf  ;;  %v46_v16 = vand.u32 2147483648, %v33_v7  ;;  %vm45_vm4 = vcmp.eq.f32.partialorder %v33_v7, 0.0 }
  0xaf   :  { %v124_v8 = vpop.eup %123 }
  0xb0   :  { %v35_v9 = vmul.f32 %v124_v8, %v30_v6 }
  0xb2   :  { %v37_v11 = vsel %vm36_vm1, %v30_v6, %v35_v9 }
  0xb3   :  { %v126_v12 = vpop.eup %125  ;;  %v40_v13 = vsel %vm38_vm2, %v39_v10, %v37_v11 }
  0xb4   :  { %v48_v14 = vadd.f32 1e-05, %v40_v13  ;;  %v42_v15 = vmul.f32 %v126_v12, %v33_v7 }
  0xb6   :  { %127 = vrcp.f32 %v48_v14  ;;  %v44_v17 = vsel %vm43_vm3, %v33_v7, %v42_v15  ;;  %v117_v22 = vadd.f32 -1e-05, %v48_v14 }
  0xb7   :  { %v47_v18 = vsel %vm45_vm4, %v46_v16, %v44_v17 }
  0xb8   :  { %v49_v19 = vadd.f32 1e-05, %v47_v18 }
  0xba   :  { %129 = vrcp.f32 %v49_v19  ;;  %v118_v27 = vadd.f32 -1e-05, %v49_v19 }
  0xc0   :  { %v128_v20 = vpop.eup %127 }
  0xc1   :  { %v51_v21 = vmul.f32 2.3, %v128_v20 }
  0xc3   :  { %v54_v23 = vmin.f32 %v51_v21, 1.0 }
  0xc4   :  { %v130_v24 = vpop.eup %129 }
  0xc5   :  { %v53_v25 = vmul.f32 2.3, %v130_v24  ;;  %v60_v26 = vmul.f32 %v117_v22, %v54_v23  ;;  %v56_v46 = vmul.f32 %v54_v23, %v23_v0 }
  0xc7   :  { %v55_v28 = vmin.f32 %v53_v25, 1.0  ;;  %v62_v29 = vmax.f32 %v60_v26, 1e-05 }
  0xc9   :  { %v61_v30 = vmul.f32 %v118_v27, %v55_v28  ;;  %v64_v31 = vmul.f32 0.31622776, %v62_v29  ;;  %v57_v48 = vmul.f32 %v55_v28, %v220_v1 }
  0xcb   :  { %v63_v32 = vmax.f32 %v61_v30, 1e-05  ;;  %v66_v33 = vmin.f32 %v64_v31, 15.0 }
  0xcd   :  { %v65_v34 = vmul.f32 0.31622776, %v63_v32  ;;  %131 = vtanh.f32 %v66_v33 }
  0xce   :  { %133 = vrcp.f32 %v64_v31 }
  0xcf   :  { %v67_v35 = vmin.f32 %v65_v34, 15.0 }
  0xd1   :  { %135 = vtanh.f32 %v67_v35 }
  0xd2   :  { %137 = vrcp.f32 %v65_v34 }
  0xd7   :  { %v132_v36 = vpop.eup %131 }
  0xd8   :  { %v78_v37 = vmul.f32 %v132_v36, %v60_v26  ;;  %v134_v38 = vpop.eup %133  ;;  %v74_v47 = vmul.f32 %v132_v36, %v56_v46 }
  0xda   :  { %v80_v39 = vmul.f32 %v134_v38, %v78_v37  ;;  %v76_v50 = vmul.f32 %v134_v38, %v74_v47 }
  0xdb   :  { %v136_v40 = vpop.eup %135 }
  0xdc   :  { %v79_v41 = vmul.f32 %v136_v40, %v61_v30  ;;  %v82_v42 = vmax.f32 %v80_v39, 1e-05  ;;  %v138_v43 = vpop.eup %137  ;;  %v75_v49 = vmul.f32 %v136_v40, %v57_v48 }
  0xde   :  { %v81_v44 = vmul.f32 %v138_v43, %v79_v41  ;;  %139 = vrcp.f32 %v82_v42  ;;  %v77_v53 = vmul.f32 %v138_v43, %v75_v49  ;;  %vm84_vm5 = vcmp.gt.f32.partialorder %v82_v42, 3.1591153 }
  0xe0   :  { %v83_v45 = vmax.f32 %v81_v44, 1e-05 }
  0xe2   :  { %141 = vrcp.f32 %v83_v45  ;;  %vm85_vm6 = vcmp.gt.f32.partialorder %v83_v45, 3.1591153 }
  0xe8   :  { %v140_v51 = vpop.eup %139 }
  0xe9   :  { %v87_v52 = vmul.f32 %v140_v51, %v76_v50 }
  0xeb   :  { %v90_v54 = vmul.f32 3.1591153, %v87_v52 }
  0xec   :  { %v142_v55 = vpop.eup %141 }
  0xed   :  { %v89_v56 = vmul.f32 %v142_v55, %v77_v53  ;;  %v96_v57 = vsel %vm84_vm5, %v90_v54, %v76_v50 }
  0xee   :  { %98 = vst.msk [vmem:[#allocation5] sm:$0xff] %vm27_vm0, %v96_v57 }
  0xef   :  { %v91_v58 = vmul.f32 3.1591153, %v89_v56 }
  0xf1   :  { %v97_v59 = vsel %vm85_vm6, %v91_v58, %v77_v53 }
  0xf2   :  { %99 = vst.msk [vmem:[#allocation5 + $0x8] sm:$0xff] %vm27_vm0, %v97_v59 }
  0xf3   :  { %176 = shalt.err (!%p173_p12)
}
  0xf4   :  { %s177_s24 = scalar_lea.hbm %s245_s1, 256 }
  0xf5   :  { %p178_p13 = scmp.ne.s32.totalorder %s245_s1, %s177_s24  ;;  %p181_p0 = scmp.lt.u32.totalorder %s177_s24, %s245_s1 }
  0xf7   :  { %p183_p1 = pnand %p181_p0, %p178_p13 }
  0xf9   :  { %186 = shalt.err (!%p183_p1)
}
  0xfa   :  { %111 = dma.vmem_to_hbm [thread:$0]  %s106_s20, 256, %s245_s1, [#allocation4], %s192_s16, %s192_s16, %s193_s17  }
  0xfb   :  { %189 = dma.done.wait [#allocation4], 256  }
  0xfc   :  { %190 = vsyncadd [#allocation4], 4294967040 }
  0xfd   :  { %115 = vsyncpa [#allocation3], 1 }
  0xfe   :  { %116 = vsyncpa [#allocation4], 1 }

</bundles_post_ra>
